<compile_context>
chip_gen: v6e
topology: v6e:2x2x1
jax: 0.10.0
libtpu: 0.0.40
codegen_flags: <defaults>
</compile_context>

<pallas_src>
import functools

import jax
import jax.numpy as jnp
from jax import lax
from jax.experimental import pallas as pl
from jax.experimental.pallas import tpu as pltpu

BN_EPS = 1e-5


def _round_up(n, m):
    return ((n + m - 1) // m) * m


def _mlp_kernel(x_ref, w1t_ref, b1_ref, w2t_ref, b2_ref, w3r_ref, b3_ref, o_ref):
    x = x_ref[...]                                            # (TB, Din)

    # layer_1 + ReLU (BN1 folded into layer_2 params).
    # Contract Din of both operands (q @ k^T style) so the hidden activations
    # come out as (H, TB): features on sublanes, batch on lanes.
    h = lax.dot_general(w1t_ref[...], x, (((1,), (1,)), ((), ())),
                        preferred_element_type=jnp.float32)   # (H, TB)
    h = jnp.maximum(h + b1_ref[...], 0.0)

    # layer_2 + ReLU (BN2 folded into layer_out params).
    h = jnp.dot(w2t_ref[...], h, preferred_element_type=jnp.float32)  # (H, TB)
    h = jnp.maximum(h + b2_ref[...], 0.0)

    # dropout(p=0.1): identity in eval mode.
    # layer_out: (1, H) @ (H, TB) -> lane-dense (1, TB) row, + scalar bias (SMEM).
    o_ref[...] = (jnp.dot(w3r_ref[...], h, preferred_element_type=jnp.float32)
                  + b3_ref[0, 0])


def _fold_bn_params(p):
    """Fold eval-mode BatchNorm1d into the following Linear; return transposed set."""
    scale1 = p["g1"] * jax.lax.rsqrt(p["rv1"] + BN_EPS)       # (1, H)
    shift1 = p["be1"] - p["rm1"] * scale1                     # (1, H)
    scale2 = p["g2"] * jax.lax.rsqrt(p["rv2"] + BN_EPS)       # (1, H)
    shift2 = p["be2"] - p["rm2"] * scale2                     # (1, H)

    w2f = p["w2"] * scale1.T                                  # (H, H)
    b2f = p["b2"] + shift1 @ p["w2"]                          # (1, H)
    w3f = p["w3"] * scale2.T                                  # (H, 1)
    b3f = p["b3"] + shift2 @ p["w3"]                          # (1, 1)

    # Transposed ("features on sublanes, batch on lanes") parameter set.
    w1t = p["w1"].T                                           # (H, Din)
    b1c = p["b1"].T                                           # (H, 1)
    w2t = w2f.T                                               # (H, H)
    b2c = b2f.T                                               # (H, 1)
    w3r = w3f.T                                               # (1, H) row vector
    return w1t, b1c, w2t, b2c, w3r, b3f


@functools.partial(jax.jit, static_argnames=("tile_b",))
def binary_classification_forward(x, params, tile_b=8192):
    """x: (B, input_dim) float32. params: dict from init_params. Returns (B, 1)."""
    B, Din = x.shape
    H = params["w1"].shape[1]

    w1t, b1c, w2t, b2c, w3r, b3 = _fold_bn_params(params)

    # --- batch tile selection (batch lives on lanes => multiples of 128) ------
    b128 = _round_up(B, 128)
    TB = max(128, (min(int(tile_b), b128) // 128) * 128)
    # v7x has 2 TensorCores: prefer >=2 grid steps when the batch can be split.
    if (b128 // TB) < 2 and b128 >= 256:
        TB = max(128, ((b128 // 2) // 128) * 128)
    B_pad = _round_up(B, TB)
    num_tiles = B_pad // TB

    if B_pad != B:
        x = jnp.pad(x, ((0, B_pad - B), (0, 0)))

    # --- VMEM budget (lane/sublane-padded, f32) -------------------------------
    lane, sub = 128, 8
    deep_buffer = (num_tiles > 2 and TB < 2048)
    nbuf = 3 if deep_buffer else 2
    x_tile_bytes = 4 * TB * _round_up(Din, lane)              # streamed (TB, Din) tile
    out_tile_bytes = 4 * _round_up(1, sub) * TB               # (1, TB) out tile
    param_bytes_vmem = 4 * (_round_up(H, sub) * _round_up(Din, lane)   # w1t
                            + _round_up(H, sub) * _round_up(H, lane)   # w2t
                            + 2 * _round_up(H, sub) * lane             # b1, b2
                            + sub * _round_up(H, lane))                # w3 row
    interm_bytes = 4 * 2 * _round_up(H, sub) * TB             # two live (H, TB) f32
    vmem_needed = (nbuf * x_tile_bytes + 2 * out_tile_bytes
                   + 2 * param_bytes_vmem + interm_bytes)
    vmem_limit = int(min(48 * 1024 * 1024,
                         max(2 * vmem_needed, 8 * 1024 * 1024)))

    # --- cost hint -------------------------------------------------------------
    raw_param_bytes = 4 * (Din * H + H + H * H + H + H + 1)
    cost = pl.CostEstimate(
        flops=2 * B_pad * (Din * H + H * H + H),
        transcendentals=0,
        bytes_accessed=4 * (B_pad * Din + B_pad) + raw_param_bytes,
    )

    if deep_buffer:
        x_spec = pl.BlockSpec((TB, Din), lambda i: (i, 0),
                              pipeline_mode=pl.Buffered(3))
    else:
        x_spec = pl.BlockSpec((TB, Din), lambda i: (i, 0))

    out = pl.pallas_call(
        _mlp_kernel,
        out_shape=jax.ShapeDtypeStruct((1, B_pad), jnp.float32),
        grid=(num_tiles,),
        in_specs=[
            x_spec,                                             # x: streamed per tile
            pl.BlockSpec((H, Din), lambda i: (0, 0)),           # w1^T: resident
            pl.BlockSpec((H, 1), lambda i: (0, 0)),             # b1 (column)
            pl.BlockSpec((H, H), lambda i: (0, 0)),             # w2^T (BN1 folded)
            pl.BlockSpec((H, 1), lambda i: (0, 0)),             # b2 (column)
            pl.BlockSpec((1, H), lambda i: (0, 0)),             # w3 row (BN2 folded)
            pl.BlockSpec(memory_space=pltpu.MemorySpace.SMEM),  # b3 scalar
        ],
        out_specs=pl.BlockSpec((1, TB), lambda i: (0, i)),      # lane-dense output row
        compiler_params=pltpu.CompilerParams(
            dimension_semantics=("parallel",),
            vmem_limit_bytes=vmem_limit,
        ),
        cost_estimate=cost,
    )(x, w1t, b1c, w2t, b2c, w3r, b3)

    return out[0, :B].reshape(B, 1)


def init_params(key, input_dim, hidden_dim):
    """Deterministic init mimicking PyTorch defaults, plus non-trivial BN stats."""
    ks = jax.random.split(key, 10)

    def linear(kw, kb, fan_in, fan_out):
        bound = 1.0 / jnp.sqrt(fan_in)
        # stored as [in, out] (transposed vs. PyTorch's [out, in])
        w = jax.random.uniform(kw, (fan_in, fan_out), jnp.float32, -bound, bound)
        b = jax.random.uniform(kb, (1, fan_out), jnp.float32, -bound, bound)
        return w, b

    w1, b1 = linear(ks[0], ks[1], input_dim, hidden_dim)
    w2, b2 = linear(ks[2], ks[3], hidden_dim, hidden_dim)
    w3, b3 = linear(ks[4], ks[5], hidden_dim, 1)

    h = hidden_dim
    return {
        "w1": w1, "b1": b1,
        "g1": jnp.ones((1, h), jnp.float32) * 1.1,
        "be1": jnp.full((1, h), 0.05, jnp.float32),
        "rm1": 0.1 * jax.random.normal(ks[6], (1, h), jnp.float32),
        "rv1": jnp.ones((1, h), jnp.float32)
               + 0.1 * jax.random.uniform(ks[7], (1, h), jnp.float32),
        "w2": w2, "b2": b2,
        "g2": jnp.ones((1, h), jnp.float32) * 0.9,
        "be2": jnp.full((1, h), -0.05, jnp.float32),
        "rm2": 0.1 * jax.random.normal(ks[8], (1, h), jnp.float32),
        "rv2": jnp.ones((1, h), jnp.float32)
               + 0.1 * jax.random.uniform(ks[9], (1, h), jnp.float32),
        "w3": w3, "b3": b3,
    }


def _reference_forward(x, p):
    """Pure-JAX reference (unfused BN, eval semantics) for correctness check."""
    h = jnp.maximum(x @ p["w1"] + p["b1"], 0.0)
    h = (h - p["rm1"]) / jnp.sqrt(p["rv1"] + BN_EPS) * p["g1"] + p["be1"]
    h = jnp.maximum(h @ p["w2"] + p["b2"], 0.0)
    h = (h - p["rm2"]) / jnp.sqrt(p["rv2"] + BN_EPS) * p["g2"] + p["be2"]
    return h @ p["w3"] + p["b3"]


if __name__ == "__main__":
    key = jax.random.PRNGKey(0)
    k_x, k_p = jax.random.split(key)

    batch, input_dim, hidden_dim = 8, 16, 32
    x = jax.random.normal(k_x, (batch, input_dim), dtype=jnp.float32)
    params = init_params(k_p, input_dim, hidden_dim)

    out = binary_classification_forward(x, params)
    out = jax.block_until_ready(out)

    ref = _reference_forward(x, params)
    assert out.shape == (batch, 1)
    assert jnp.allclose(out, ref, atol=1e-4, rtol=1e-4)

    print("KERNEL_OK")
</pallas_src>

<mosaic_0001>
module attributes {stable_mosaic.version = 11 : i64} {
  func.func @_mlp_kernel(%arg0: i32, %arg1: memref<128x16xf32, #tpu.memory_space<vmem>>, %arg2: memref<32x16xf32, #tpu.memory_space<vmem>>, %arg3: memref<32x1xf32, #tpu.memory_space<vmem>>, %arg4: memref<32x32xf32, #tpu.memory_space<vmem>>, %arg5: memref<32x1xf32, #tpu.memory_space<vmem>>, %arg6: memref<1x32xf32, #tpu.memory_space<vmem>>, %arg7: memref<1x1xf32, #tpu.memory_space<smem>>, %arg8: memref<1x128xf32, #tpu.memory_space<vmem>>) attributes {dimension_semantics = [#tpu.dimension_semantics<parallel>], iteration_bounds = array<i64: 1>, scalar_prefetch = 0 : i64, scratch_operands = 0 : i64, tpu.core_type = #tpu.core_type<tc>, window_params = [{transform_indices = @transform_0, window_bounds = array<i64: 128, 16>}, {pipeline_mode = #tpu.pipeline_mode<synchronous>, transform_indices = @transform_1, window_bounds = array<i64: 32, 16>}, {pipeline_mode = #tpu.pipeline_mode<synchronous>, transform_indices = @transform_2, window_bounds = array<i64: 32, 1>}, {pipeline_mode = #tpu.pipeline_mode<synchronous>, transform_indices = @transform_3, window_bounds = array<i64: 32, 32>}, {pipeline_mode = #tpu.pipeline_mode<synchronous>, transform_indices = @transform_4, window_bounds = array<i64: 32, 1>}, {pipeline_mode = #tpu.pipeline_mode<synchronous>, transform_indices = @transform_5, window_bounds = array<i64: 1, 32>}, {transform_indices = @transform_6, window_bounds = array<i64: 1, 1>}, {transform_indices = @transform_7, window_bounds = array<i64: 1, 128>}]} {
    %c0 = arith.constant 0 : index
    %c0_0 = arith.constant 0 : index
    %0 = vector.load %arg1[%c0, %c0_0] : memref<128x16xf32, #tpu.memory_space<vmem>>, vector<128x16xf32>
    %c0_1 = arith.constant 0 : index
    %c0_2 = arith.constant 0 : index
    %1 = vector.load %arg2[%c0_1, %c0_2] : memref<32x16xf32, #tpu.memory_space<vmem>>, vector<32x16xf32>
    %cst = arith.constant dense<0.000000e+00> : vector<32x128xf32>
    %2 = tpu.matmul %1, %0, %cst {dimension_numbers = #tpu.dot_dimension_numbers<[1], [1], [0], [0], [0, 0, 1, 0], [], []>} : vector<32x16xf32>, vector<128x16xf32>, vector<32x128xf32> -> vector<32x128xf32>
    %c0_3 = arith.constant 0 : index
    %c0_4 = arith.constant 0 : index
    %3 = vector.load %arg3[%c0_3, %c0_4] : memref<32x1xf32, #tpu.memory_space<vmem>>, vector<32x1xf32>
    %4 = vector.broadcast %3 : vector<32x1xf32> to vector<32x128xf32>
    %5 = arith.addf %2, %4 : vector<32x128xf32>
    %cst_5 = arith.constant 0.000000e+00 : f32
    %6 = vector.broadcast %cst_5 : f32 to vector<32x128xf32>
    %7 = arith.maximumf %5, %6 : vector<32x128xf32>
    %c0_6 = arith.constant 0 : index
    %c0_7 = arith.constant 0 : index
    %8 = vector.load %arg4[%c0_6, %c0_7] : memref<32x32xf32, #tpu.memory_space<vmem>>, vector<32x32xf32>
    %cst_8 = arith.constant dense<0.000000e+00> : vector<32x128xf32>
    %9 = tpu.matmul %8, %7, %cst_8 {dimension_numbers = #tpu.dot_dimension_numbers<[1], [0], [0], [1], [0, 0, 1, 1], [], []>} : vector<32x32xf32>, vector<32x128xf32>, vector<32x128xf32> -> vector<32x128xf32>
    %c0_9 = arith.constant 0 : index
    %c0_10 = arith.constant 0 : index
    %10 = vector.load %arg5[%c0_9, %c0_10] : memref<32x1xf32, #tpu.memory_space<vmem>>, vector<32x1xf32>
    %11 = vector.broadcast %10 : vector<32x1xf32> to vector<32x128xf32>
    %12 = arith.addf %9, %11 : vector<32x128xf32>
    %cst_11 = arith.constant 0.000000e+00 : f32
    %13 = vector.broadcast %cst_11 : f32 to vector<32x128xf32>
    %14 = arith.maximumf %12, %13 : vector<32x128xf32>
    %c0_12 = arith.constant 0 : index
    %c0_13 = arith.constant 0 : index
    %15 = vector.load %arg6[%c0_12, %c0_13] : memref<1x32xf32, #tpu.memory_space<vmem>>, vector<1x32xf32>
    %cst_14 = arith.constant dense<0.000000e+00> : vector<1x128xf32>
    %16 = tpu.matmul %15, %14, %cst_14 {dimension_numbers = #tpu.dot_dimension_numbers<[1], [0], [0], [1], [0, 0, 1, 1], [], []>} : vector<1x32xf32>, vector<32x128xf32>, vector<1x128xf32> -> vector<1x128xf32>
    %c0_15 = arith.constant 0 : index
    %c0_16 = arith.constant 0 : index
    %17 = memref.load %arg7[%c0_15, %c0_16] : memref<1x1xf32, #tpu.memory_space<smem>>
    %18 = vector.broadcast %17 : f32 to vector<1x128xf32>
    %19 = arith.addf %16, %18 : vector<1x128xf32>
    %c0_17 = arith.constant 0 : index
    %c0_18 = arith.constant 0 : index
    %20 = vector.load %arg8[%c0_17, %c0_18] : memref<1x128xf32, #tpu.memory_space<vmem>>, vector<1x128xf32>
    tpu.vector_store %arg8[%c0_17, %c0_18], %19 {strides = array<i32>} : memref<1x128xf32, #tpu.memory_space<vmem>>, vector<1x128xf32>,
    return
  }
  func.func @transform_0(%arg0: i32) -> (i32, i32) {
    %c0_i32 = arith.constant 0 : i32
    %c0_i32_0 = arith.constant 0 : i32
    return %arg0, %c0_i32 : i32, i32
  }
  func.func @transform_1(%arg0: i32) -> (i32, i32) {
    %c0_i32 = arith.constant 0 : i32
    %c0_i32_0 = arith.constant 0 : i32
    %c0_i32_1 = arith.constant 0 : i32
    return %c0_i32, %c0_i32_0 : i32, i32
  }
  func.func @transform_2(%arg0: i32) -> (i32, i32) {
    %c0_i32 = arith.constant 0 : i32
    %c0_i32_0 = arith.constant 0 : i32
    %c0_i32_1 = arith.constant 0 : i32
    return %c0_i32, %c0_i32_0 : i32, i32
  }
  func.func @transform_3(%arg0: i32) -> (i32, i32) {
    %c0_i32 = arith.constant 0 : i32
    %c0_i32_0 = arith.constant 0 : i32
    %c0_i32_1 = arith.constant 0 : i32
    return %c0_i32, %c0_i32_0 : i32, i32
  }
  func.func @transform_4(%arg0: i32) -> (i32, i32) {
    %c0_i32 = arith.constant 0 : i32
    %c0_i32_0 = arith.constant 0 : i32
    %c0_i32_1 = arith.constant 0 : i32
    return %c0_i32, %c0_i32_0 : i32, i32
  }
  func.func @transform_5(%arg0: i32) -> (i32, i32) {
    %c0_i32 = arith.constant 0 : i32
    %c0_i32_0 = arith.constant 0 : i32
    %c0_i32_1 = arith.constant 0 : i32
    return %c0_i32, %c0_i32_0 : i32, i32
  }
  func.func @transform_6(%arg0: i32) -> (i32, i32) {
    %c0_i32 = arith.constant 0 : i32
    %c0_i32_0 = arith.constant 0 : i32
    %c0_i32_1 = arith.constant 0 : i32
    return %c0_i32, %c0_i32_0 : i32, i32
  }
  func.func @transform_7(%arg0: i32) -> (i32, i32) {
    %c0_i32 = arith.constant 0 : i32
    %c0_i32_0 = arith.constant 0 : i32
    return %c0_i32, %arg0 : i32, i32
  }
}

</mosaic_0001>

<bundles_post_ra>
// kernel: binary_classification_forward.1
= control target key start
LH: loop header
LB: loop body
LE: loop exit
PB: predicated region body
PF: predicated region fallthrough
CT: control target
= control target key end

     0   :  { %vm71_vm0 = vcmask 130048   ;;  %v558_v2 = vmov 0   ;;  %vm249_vm1 = vcmask 261120   ;;  %v559_v49 = vmov 0.0   ;;  %s747_s0 = inlined_call_operand.vmem [shape: f32[128,16], index: 0, kind: input, shape index: {}]   ;;  %s748_s1 = inlined_call_operand.vmem [shape: f32[32,16], index: 1, kind: input, shape index: {}]   ;;  %s749_s2 = inlined_call_operand.vmem [shape: f32[32,1], index: 2, kind: input, shape index: {}]   ;;  %s750_s4 = inlined_call_operand.vmem [shape: f32[32,1], index: 4, kind: input, shape index: {}]   ;;  %s751_s3 = inlined_call_operand.vmem [shape: f32[32,32], index: 3, kind: input, shape index: {}]   ;;  %s752_s5 = inlined_call_operand.vmem [shape: f32[1,32], index: 5, kind: input, shape index: {}]   ;;  %s753_s6 = inlined_call_operand.<no memory space> [shape: f32[1,1], index: 6, kind: input, shape index: {}]   ;;  %s754_s7 = inlined_call_operand.vmem [shape: f32[1,128], index: 7, kind: output, shape index: {}]  }
   0x1   :  { %v42_v0 = vld [vmem:[%s747_s0 + $0x78] sm:$0xff]  ;;  %v41_v1 = vld [vmem:[%s747_s0 + $0x70] sm:$0xff]  ;;  %556 = vset.pattern.permute.xlu0 %v558_v2  ;;  %557 = vset.pattern.permute.xlu1 %v558_v2  ;;  %v40_v3 = vld [vmem:[%s747_s0 + $0x68] sm:$0xff]  ;;  %vm560_vm2 = vmmov 0  }
   0x2   :  { %490 = vmatprep.subr.msk.mxu0 %vm71_vm0, %v42_v0  ;;  %v43_v4 = vld [vmem:[%s748_s1] sm:$0xff]  ;;  %v50_v5 = vld [vmem:[%s749_s2 + $0x18] sm:$0xff]  ;;  %v48_v6 = vld [vmem:[%s749_s2 + $0x8] sm:$0xff] }
   0x3   :  { %491 = vmatpush3.xpose.msk.msra.mxu0 %vm71_vm0, %v42_v0  ;;  %522 = vmatprep.mubr.msk.f32.mxu0 %vm71_vm0, %v43_v4  ;;  %v39_v7 = vld [vmem:[%s747_s0 + $0x60] sm:$0xff]  ;;  %v49_v8 = vld [vmem:[%s749_s2 + $0x10] sm:$0xff]  ;;  %v38_v10 = vld [vmem:[%s747_s0 + $0x58] sm:$0xff] }
   0x4   :  { %492 = vmatprep.subr.msk.mxu0 %vm71_vm0, %v41_v1  ;;  %68 = vperm.xlu0 %556, %v50_v5   ;;  %v47_v9 = vld [vmem:[%s749_s2] sm:$0xff]  ;;  %v228_v11 = vld [vmem:[%s750_s4 + $0x18] sm:$0xff]  ;;  %v227_v12 = vld [vmem:[%s750_s4 + $0x10] sm:$0xff] }
   0x5   :  { %58 = vperm.xlu1 %557, %v48_v6   ;;  %v37_v13 = vld [vmem:[%s747_s0 + $0x50] sm:$0xff]  ;;  %v226_v14 = vld [vmem:[%s750_s4 + $0x8] sm:$0xff]  ;;  %v225_v15 = vld [vmem:[%s750_s4] sm:$0xff] }
   0x6   :  { %v36_v16 = vld [vmem:[%s747_s0 + $0x48] sm:$0xff]  ;;  %v35_v17 = vld [vmem:[%s747_s0 + $0x40] sm:$0xff]  ;;  %v34_v18 = vld [vmem:[%s747_s0 + $0x38] sm:$0xff] }
   0x7   :  { %493 = vmatpush3.xpose.msk.msra.mxu0 %vm71_vm0, %v41_v1  ;;  %v33_v19 = vld [vmem:[%s747_s0 + $0x30] sm:$0xff]  ;;  %v32_v20 = vld [vmem:[%s747_s0 + $0x28] sm:$0xff]  ;;  %v31_v21 = vld [vmem:[%s747_s0 + $0x20] sm:$0xff] }
   0x8   :  { %494 = vmatprep.subr.msk.mxu0 %vm71_vm0, %v40_v3  ;;  %63 = vperm.xlu0 %556, %v49_v8   ;;  %v30_v22 = vld [vmem:[%s747_s0 + $0x18] sm:$0xff]  ;;  %v29_v23 = vld [vmem:[%s747_s0 + $0x10] sm:$0xff]  ;;  %v28_v24 = vld [vmem:[%s747_s0 + $0x8] sm:$0xff] }
   0x9   :  { %53 = vperm.xlu1 %557, %v47_v9   ;;  %v27_v25 = vld [vmem:[%s747_s0] sm:$0xff]  ;;  %v44_v26 = vld [vmem:[%s748_s1 + $0x8] sm:$0xff]  ;;  %v45_v27 = vld [vmem:[%s748_s1 + $0x10] sm:$0xff] }
   0xa   :  { %v46_v28 = vld [vmem:[%s748_s1 + $0x18] sm:$0xff]  ;;  %v221_v29 = vld [vmem:[%s751_s3] sm:$0xff]  ;;  %v222_v46 = vld [vmem:[%s751_s3 + $0x8] sm:$0xff] }
   0xb   :  { %495 = vmatpush3.xpose.msk.msra.mxu0 %vm71_vm0, %v40_v3  ;;  %536 = vmatprep.mubr.msk.f32.mxu1 %vm249_vm1, %v221_v29  ;;  %v223_v47 = vld [vmem:[%s751_s3 + $0x10] sm:$0xff]  ;;  %v224_v48 = vld [vmem:[%s751_s3 + $0x18] sm:$0xff]  ;;  %v351_v2 = vld [vmem:[%s752_s5] sm:$0x1]  ;;  %v353_v3 = vstv %s753_s6 }
   0xc   :  { %496 = vmatprep.subr.msk.mxu0 %vm71_vm0, %v39_v7  ;;  %246 = vperm.xlu0 %556, %v228_v11  }
   0xd   :  { %241 = vperm.xlu1 %557, %v227_v12  }
   0xf   :  { %497 = vmatpush3.xpose.msk.msra.mxu0 %vm71_vm0, %v39_v7 }
  0x10   :  { %498 = vmatprep.subr.msk.mxu0 %vm71_vm0, %v38_v10  ;;  %236 = vperm.xlu0 %556, %v226_v14  }
  0x11   :  { %231 = vperm.xlu1 %557, %v225_v15  }
  0x13   :  { %499 = vmatpush3.xpose.msk.msra.mxu0 %vm71_vm0, %v38_v10 }
  0x14   :  { %500 = vmatprep.subr.msk.mxu0 %vm71_vm0, %v37_v13 }
  0x17   :  { %501 = vmatpush3.xpose.msk.msra.mxu0 %vm71_vm0, %v37_v13 }
  0x18   :  { %502 = vmatprep.subr.msk.mxu0 %vm71_vm0, %v36_v16 }
  0x1b   :  { %503 = vmatpush3.xpose.msk.msra.mxu0 %vm71_vm0, %v36_v16 }
  0x1c   :  { %504 = vmatprep.subr.msk.mxu0 %vm71_vm0, %v35_v17 }
  0x1f   :  { %505 = vmatpush3.xpose.msk.msra.mxu0 %vm71_vm0, %v35_v17 }
  0x20   :  { %506 = vmatprep.subr.msk.mxu0 %vm71_vm0, %v34_v18 }
  0x23   :  { %507 = vmatpush3.xpose.msk.msra.mxu0 %vm71_vm0, %v34_v18 }
  0x24   :  { %508 = vmatprep.subr.msk.mxu0 %vm71_vm0, %v33_v19 }
  0x27   :  { %509 = vmatpush3.xpose.msk.msra.mxu0 %vm71_vm0, %v33_v19 }
  0x28   :  { %510 = vmatprep.subr.msk.mxu0 %vm71_vm0, %v32_v20 }
  0x2b   :  { %511 = vmatpush3.xpose.msk.msra.mxu0 %vm71_vm0, %v32_v20 }
  0x2c   :  { %512 = vmatprep.subr.msk.mxu0 %vm71_vm0, %v31_v21 }
  0x2f   :  { %513 = vmatpush3.xpose.msk.msra.mxu0 %vm71_vm0, %v31_v21 }
  0x30   :  { %514 = vmatprep.subr.msk.mxu0 %vm71_vm0, %v30_v22 }
  0x33   :  { %515 = vmatpush3.xpose.msk.msra.mxu0 %vm71_vm0, %v30_v22 }
  0x34   :  { %516 = vmatprep.subr.msk.mxu0 %vm71_vm0, %v29_v23 }
  0x37   :  { %517 = vmatpush3.xpose.msk.msra.mxu0 %vm71_vm0, %v29_v23 }
  0x38   :  { %518 = vmatprep.subr.msk.mxu0 %vm71_vm0, %v28_v24 }
  0x3b   :  { %519 = vmatpush3.xpose.msk.msra.mxu0 %vm71_vm0, %v28_v24 }
  0x3c   :  { %520 = vmatprep.subr.msk.mxu0 %vm71_vm0, %v27_v25 }
  0x3f   :  { %521 = vmatpush3.xpose.msk.msra.mxu0 %vm71_vm0, %v27_v25 }
  0x42   :  { %523 = vmatmul.mubr.msk.f32.vlgmr.msra.gmra.mxu0 %vm71_vm0, %v44_v26 }
  0x43   :  { %525 = vmatprep.mubr.msk.f32.mxu0 %vm71_vm0, %v45_v27 }
  0x46   :  { %526 = vmatmul.mubr.msk.f32.gmra.mxu0 %vm71_vm0, %v46_v28 }
  0x7f   :  { %v69_v30 = vpop.permute.xlu0 %68 }
  0x80   :  { %v59_v32 = vpop.permute.xlu1 %58 }
  0x83   :  { %v64_v36 = vpop.permute.xlu0 %63 }
  0x84   :  { %v54_v41 = vpop.permute.xlu1 %53 }
  0x87   :  { %v247_v50 = vpop.permute.xlu0 %246 }
  0x88   :  { %v242_v52 = vpop.permute.xlu1 %241 }
  0x8b   :  { %v237_v56 = vpop.permute.xlu0 %236 }
  0x8c   :  { %v232_v61 = vpop.permute.xlu1 %231 }
 0x102   :  { %v524_v31 = vpop.f32.mrf.mxu0 }
 0x103   :  { %v204_v38 = vadd.f32 %v524_v31, %v59_v32 }
 0x104   :  { %v198_v33 = vpop.f32.mrf.mxu0 }
 0x105   :  { %v199_v42 = vadd.f32 %v198_v33, %v54_v41  ;;  %v218_v44 = vmax.f32 %v204_v38, 0.0 }
 0x106   :  { %v527_v34 = vpop.f32.mrf.mxu0 }
 0x107   :  { %v214_v35 = vadd.f32 %v527_v34, %v69_v30  ;;  %v217_v45 = vmax.f32 %v199_v42, 0.0 }
 0x108   :  { %v208_v37 = vpop.f32.mrf.mxu0 }
 0x109   :  { %v220_v39 = vmax.f32 %v214_v35, 0.0  ;;  %v209_v40 = vadd.f32 %v208_v37, %v64_v36 }
 0x10b   :  { %v219_v43 = vmax.f32 %v209_v40, 0.0  ;;  %528 = vmatprep.subr.mxu1 %v220_v39 }
 0x10c   :  { %529 = vmatpush3.msra.mxu1 %v220_v39 }
 0x10d   :  { %530 = vmatprep.subr.mxu1 %v219_v43 }
 0x10e   :  { %531 = vmatpush3.msra.mxu1 %v219_v43 }
 0x10f   :  { %532 = vmatprep.subr.mxu1 %v218_v44 }
 0x110   :  { %533 = vmatpush3.msra.mxu1 %v218_v44 }
 0x111   :  { %534 = vmatprep.subr.mxu1 %v217_v45 }
 0x112   :  { %535 = vmatpush3.msra.mxu1 %v217_v45 }
 0x113   :  { %537 = vmatmul.mubr.msk.f32.vlgmr.msra.gmra.mxu1 %vm249_vm1, %v222_v46  ;;  %542 = vmatprep.subr.mxu1 %v559_v49 }
 0x114   :  { %539 = vmatprep.mubr.msk.f32.mxu1 %vm249_vm1, %v223_v47 }
 0x117   :  { %540 = vmatmul.mubr.msk.f32.gmra.mxu1 %vm249_vm1, %v224_v48 }
 0x118   :  { %550 = vmatprep.mubr.msk.f32.mxu1 %vm560_vm2, %v559_v49 }
 0x1d3   :  { %v538_v51 = vpop.f32.mrf.mxu1 }
 0x1d4   :  { %v334_v58 = vadd.f32 %v538_v51, %v237_v56 }
 0x1d5   :  { %v328_v53 = vpop.f32.mrf.mxu1 }
 0x1d6   :  { %v329_v62 = vadd.f32 %v328_v53, %v232_v61  ;;  %v348_v0 = vmax.f32 %v334_v58, 0.0 }
 0x1d7   :  { %v541_v54 = vpop.f32.mrf.mxu1 }
 0x1d8   :  { %v344_v55 = vadd.f32 %v541_v54, %v247_v50  ;;  %v347_v1 = vmax.f32 %v329_v62, 0.0 }
 0x1d9   :  { %v338_v57 = vpop.f32.mrf.mxu1 }
 0x1da   :  { %v350_v59 = vmax.f32 %v344_v55, 0.0  ;;  %v339_v60 = vadd.f32 %v338_v57, %v242_v52 }
 0x1dc   :  { %v349_v63 = vmax.f32 %v339_v60, 0.0  ;;  %543 = vmatpush3.msra.mxu1 %v350_v59 }
 0x1dd   :  { %544 = vmatprep.subr.mxu1 %v559_v49 }
 0x1de   :  { %545 = vmatpush3.msra.mxu1 %v349_v63 }
 0x1df   :  { %546 = vmatprep.subr.mxu1 %v559_v49 }
 0x1e0   :  { %547 = vmatpush3.msra.mxu1 %v348_v0 }
 0x1e1   :  { %548 = vmatprep.subr.mxu1 %v559_v49 }
 0x1e2   :  { %549 = vmatpush3.msra.mxu1 %v347_v1 }
 0x1e3   :  { %551 = vmatmul.mubr.msk.f32.vlgmr.msra.gmra.mxu1 %vm249_vm1, %v351_v2 }
 0x2a3   :  { %v423_v4 = vpop.f32.mrf.mxu1 }
 0x2a4   :  { %v424_v5 = vadd.f32 %v423_v4, %v353_v3 }
 0x2a5   :  { %v552_v6 = vpop.f32.mrf.mxu1 }
 0x2a6   :  { %427 = vst [vmem:[%s754_s7] sm:$0x1] %v424_v5 }

</bundles_post_ra>
